<compile_context>
chip_gen: v7x
topology: tpu7x:2x2x1
jax: 0.10.0
libtpu: 0.0.40
codegen_flags: <defaults>
</compile_context>

<pallas_src>
import jax
import jax.numpy as jnp
from jax.experimental import pallas as pl
from jax.experimental.pallas import tpu as pltpu

# Synthetic environment dims (e.g. CartPole-v0): obs dim 4, 2 discrete actions.
N_STATES = 4
N_ACTIONS = 2
HIDDEN = 50

# Padded / packed layout constants (feature-major).
IN_PAD = 8                    # x^T feature rows padded 4 -> 8 (sublane multiple)
HIDDEN_PAD = 128              # hidden rows padded 50 -> 128 (full lane width for layer-2 K)
OUT_PAD = 8                   # output rows padded 2 -> 8 (sublane multiple)
B1_COL = IN_PAD               # slab column holding b1 (just outside the W1^T block)
B2_CARRIER_ROW = HIDDEN       # hidden row pinned to 1.0 -> carries b2 through matmul 2
P_ROWS = HIDDEN_PAD + OUT_PAD # packed slab rows: W1^T/b1 block (128) + W2^T/b2 block (8)

TB = 1024                     # batch columns per grid step (lane dim, multiple of 128)
SMALL_BATCH_CUTOFF = 64       # below this, plain XLA is as fast as the kernel


def _round_up(x, m):
    return ((x + m - 1) // m) * m


def _net_kernel(x_ref, p_ref, o_ref):
    """o = W2^T @ relu(W1^T @ x + b1);  b2 is folded into W2^T via the const-1 hidden row."""
    x = x_ref[...]                                    # (IN_PAD, TB)
    w1t = p_ref[0:HIDDEN_PAD, 0:IN_PAD]               # (128, 8): rows 0..49 / cols 0..3 = W1^T
    b1 = p_ref[0:HIDDEN_PAD, B1_COL:B1_COL + 1]       # (128, 1): rows 0..49 = b1, row 50 = 1.0
    w2t = p_ref[HIDDEN_PAD:P_ROWS, 0:HIDDEN_PAD]      # (8, 128): rows 0..1 = W2^T, col 50 = b2
    h = jnp.maximum(
        jnp.dot(w1t, x, preferred_element_type=jnp.float32) + b1, 0.0)   # (128, TB); relu(1)=1 keeps b2 carrier
    o_ref[...] = jnp.dot(w2t, h, preferred_element_type=jnp.float32)     # (8, TB), lane-dense store


def pack_params(w1, b1, w2, b2):
    """Pack (w1, b1, w2, b2) into one zero-padded (136, 128) f32 slab (feature-major).

    w1: (N_STATES, HIDDEN)  -- PyTorch fc1.weight.T
    b1: (HIDDEN,)
    w2: (HIDDEN, N_ACTIONS) -- PyTorch out.weight.T
    b2: (N_ACTIONS,)
    NOTE: the b2 fold relies on the activation satisfying act(1.0) == 1.0 (true for ReLU).
    """
    slab = jnp.zeros((P_ROWS, HIDDEN_PAD), jnp.float32)
    # Layer-1 block (rows 0..127): W1^T in cols 0..3, b1 in col 8, b2 carrier at [50, 8].
    slab = slab.at[:HIDDEN, :N_STATES].set(jnp.asarray(w1, jnp.float32).T)
    slab = slab.at[:HIDDEN, B1_COL].set(jnp.asarray(b1, jnp.float32))
    slab = slab.at[B2_CARRIER_ROW, B1_COL].set(1.0)     # h[50, :] == 1.0 after relu -> carries b2
    # Layer-2 block (rows 128..135): W2^T in cols 0..49, b2 in col 50.
    slab = slab.at[HIDDEN_PAD:HIDDEN_PAD + N_ACTIONS, :HIDDEN].set(jnp.asarray(w2, jnp.float32).T)
    slab = slab.at[HIDDEN_PAD:HIDDEN_PAD + N_ACTIONS, B2_CARRIER_ROW].set(jnp.asarray(b2, jnp.float32))
    return slab


@jax.jit
def net_forward_pallas(x, packed_params):
    """x: (B, N_STATES) f32, packed_params: (136, 128) f32 -> (B, N_ACTIONS) f32."""
    B = x.shape[0]
    tb = min(TB, _round_up(max(B, 1), 128))
    B_pad = _round_up(B, tb)
    grid = (B_pad // tb,)

    # Feature-major, zero-padded input: rows 0..3 = x^T, rows 4..7 and padded batch cols = 0.
    xT = jnp.zeros((IN_PAD, B_pad), jnp.float32)
    xT = xT.at[:N_STATES, :B].set(x.astype(jnp.float32).T)

    flops = 2 * B_pad * (IN_PAD * HIDDEN_PAD + HIDDEN_PAD * OUT_PAD)
    bytes_accessed = 4 * (IN_PAD * B_pad + P_ROWS * HIDDEN_PAD + OUT_PAD * B_pad)

    out_t = pl.pallas_call(
        _net_kernel,
        out_shape=jax.ShapeDtypeStruct((OUT_PAD, B_pad), jnp.float32),
        grid=grid,
        in_specs=[
            pl.BlockSpec((IN_PAD, tb), lambda i: (0, i)),           # batch tile, pipelined
            pl.BlockSpec((P_ROWS, HIDDEN_PAD), lambda i: (0, 0)),   # param slab, resident
        ],
        out_specs=pl.BlockSpec((OUT_PAD, tb), lambda i: (0, i)),
        compiler_params=pltpu.CompilerParams(
            dimension_semantics=("parallel",)),                     # v7x: split batch over both TCs
        cost_estimate=pl.CostEstimate(
            flops=flops, transcendentals=0, bytes_accessed=bytes_accessed),
    )(xT, packed_params)

    # Padded batch columns contain relu(b1)-derived garbage; slice before any use.
    return out_t[:N_ACTIONS, :B].T


@jax.jit
def _net_forward_jnp(x, packed_params):
    """Plain-XLA path for tiny batches (B=1 greedy action selection)."""
    w1t = packed_params[:HIDDEN, :N_STATES]                                # (50, 4)
    b1 = packed_params[:HIDDEN, B1_COL]                                    # (50,)
    w2t = packed_params[HIDDEN_PAD:HIDDEN_PAD + N_ACTIONS, :HIDDEN]        # (2, 50)
    b2 = packed_params[HIDDEN_PAD:HIDDEN_PAD + N_ACTIONS, B2_CARRIER_ROW]  # (2,)
    h = jnp.maximum(x.astype(jnp.float32) @ w1t.T + b1, 0.0)
    return h @ w2t.T + b2


def net_forward(x, packed_params):
    """Dispatcher: tiny batches -> fused XLA; replay / vectorized-env batches -> Pallas."""
    if x.shape[0] < SMALL_BATCH_CUTOFF:
        return _net_forward_jnp(x, packed_params)
    return net_forward_pallas(x, packed_params)


def init_params(key):
    """Deterministic init mirroring the PyTorch module:
       weights ~ N(0, 0.1); biases ~ U(-1/sqrt(fan_in), 1/sqrt(fan_in))."""
    k1, k2, k3, k4 = jax.random.split(key, 4)
    # Stored as (in, out) == PyTorch weight.T
    w1 = 0.1 * jax.random.normal(k1, (N_STATES, HIDDEN), jnp.float32)
    w2 = 0.1 * jax.random.normal(k2, (HIDDEN, N_ACTIONS), jnp.float32)
    bound1 = 1.0 / jnp.sqrt(jnp.float32(N_STATES))
    bound2 = 1.0 / jnp.sqrt(jnp.float32(HIDDEN))
    b1 = jax.random.uniform(k3, (HIDDEN,), jnp.float32, -bound1, bound1)
    b2 = jax.random.uniform(k4, (N_ACTIONS,), jnp.float32, -bound2, bound2)
    return w1, b1, w2, b2


if __name__ == "__main__":
    key = jax.random.PRNGKey(0)
    kx, kp, kx2 = jax.random.split(key, 3)

    w1, b1, w2, b2 = init_params(kp)
    packed = pack_params(w1, b1, w2, b2)

    def ref(x):
        return jnp.maximum(x @ w1 + b1, 0.0) @ w2 + b2

    # Small batch through the Pallas path (single-tile grid).
    x_small = jax.random.normal(kx, (8, N_STATES), jnp.float32)
    out_small = jax.block_until_ready(net_forward_pallas(x_small, packed))
    assert out_small.shape == (8, N_ACTIONS)
    assert jnp.allclose(out_small, ref(x_small), atol=1e-5, rtol=1e-5)

    # Larger batch exercising the multi-step grid + batch padding (2500 -> 3 tiles of 1024).
    x_big = jax.random.normal(kx2, (2500, N_STATES), jnp.float32)
    out_big = jax.block_until_ready(net_forward_pallas(x_big, packed))
    assert out_big.shape == (2500, N_ACTIONS)
    assert jnp.allclose(out_big, ref(x_big), atol=1e-4, rtol=1e-4)

    # Dispatcher path (small B -> plain-jnp fallback).
    out_disp = jax.block_until_ready(net_forward(x_small, packed))
    assert jnp.allclose(out_disp, ref(x_small), atol=1e-5, rtol=1e-5)

    print("KERNEL_OK")
</pallas_src>

<mosaic_0001>
module attributes {stable_mosaic.version = 11 : i64} {
  func.func @_net_kernel(%arg0: i32, %arg1: memref<8x128xf32, #tpu.memory_space<vmem>>, %arg2: memref<136x128xf32, #tpu.memory_space<vmem>>, %arg3: memref<8x128xf32, #tpu.memory_space<vmem>>) attributes {dimension_semantics = [#tpu.dimension_semantics<parallel>], iteration_bounds = array<i64: 1>, scalar_prefetch = 0 : i64, scratch_operands = 0 : i64, tpu.core_type = #tpu.core_type<tc>, window_params = [{transform_indices = @transform_0, window_bounds = array<i64: 8, 128>}, {pipeline_mode = #tpu.pipeline_mode<synchronous>, transform_indices = @transform_1, window_bounds = array<i64: 136, 128>}, {transform_indices = @transform_2, window_bounds = array<i64: 8, 128>}]} {
    %c0 = arith.constant 0 : index
    %c0_0 = arith.constant 0 : index
    %0 = vector.load %arg1[%c0, %c0_0] : memref<8x128xf32, #tpu.memory_space<vmem>>, vector<8x128xf32>
    %c0_1 = arith.constant 0 : index
    %c0_2 = arith.constant 0 : index
    %1 = vector.load %arg2[%c0_1, %c0_2] : memref<136x128xf32, #tpu.memory_space<vmem>>, vector<128x8xf32>
    %c0_3 = arith.constant 0 : index
    %c8 = arith.constant 8 : index
    %2 = vector.load %arg2[%c0_3, %c8] : memref<136x128xf32, #tpu.memory_space<vmem>>, vector<128x1xf32>
    %c128 = arith.constant 128 : index
    %c0_4 = arith.constant 0 : index
    %3 = vector.load %arg2[%c128, %c0_4] : memref<136x128xf32, #tpu.memory_space<vmem>>, vector<8x128xf32>
    %cst = arith.constant dense<0.000000e+00> : vector<128x128xf32>
    %4 = tpu.matmul %1, %0, %cst {dimension_numbers = #tpu.dot_dimension_numbers<[1], [0], [0], [1], [0, 0, 1, 1], [], []>} : vector<128x8xf32>, vector<8x128xf32>, vector<128x128xf32> -> vector<128x128xf32>
    %5 = vector.broadcast %2 : vector<128x1xf32> to vector<128x128xf32>
    %6 = arith.addf %4, %5 : vector<128x128xf32>
    %cst_5 = arith.constant 0.000000e+00 : f32
    %7 = vector.broadcast %cst_5 : f32 to vector<128x128xf32>
    %8 = arith.maximumf %6, %7 : vector<128x128xf32>
    %cst_6 = arith.constant dense<0.000000e+00> : vector<8x128xf32>
    %9 = tpu.matmul %3, %8, %cst_6 {dimension_numbers = #tpu.dot_dimension_numbers<[1], [0], [0], [1], [0, 0, 1, 1], [], []>} : vector<8x128xf32>, vector<128x128xf32>, vector<8x128xf32> -> vector<8x128xf32>
    %c0_7 = arith.constant 0 : index
    %c0_8 = arith.constant 0 : index
    %10 = vector.load %arg3[%c0_7, %c0_8] : memref<8x128xf32, #tpu.memory_space<vmem>>, vector<8x128xf32>
    tpu.vector_store %arg3[%c0_7, %c0_8], %9 {strides = array<i32>} : memref<8x128xf32, #tpu.memory_space<vmem>>, vector<8x128xf32>,
    return
  }
  func.func @transform_0(%arg0: i32) -> (i32, i32) {
    %c0_i32 = arith.constant 0 : i32
    %c0_i32_0 = arith.constant 0 : i32
    return %c0_i32, %arg0 : i32, i32
  }
  func.func @transform_1(%arg0: i32) -> (i32, i32) {
    %c0_i32 = arith.constant 0 : i32
    %c0_i32_0 = arith.constant 0 : i32
    %c0_i32_1 = arith.constant 0 : i32
    return %c0_i32, %c0_i32_0 : i32, i32
  }
  func.func @transform_2(%arg0: i32) -> (i32, i32) {
    %c0_i32 = arith.constant 0 : i32
    %c0_i32_0 = arith.constant 0 : i32
    return %c0_i32, %arg0 : i32, i32
  }
}

</mosaic_0001>

<bundles_post_ra>
// kernel: net_forward_pallas.1
= control target key start
LH: loop header
LB: loop body
LE: loop exit
PB: predicated region body
PF: predicated region fallthrough
CT: control target
= control target key end

     0   :  { %7 = vsyncpa [#allocation3], 0  ;;  %s561_s9 = smov [#allocation2]   ;;  %s625_s0 = inlined_call_operand.vmem [shape: f32[8,128], index: 0, kind: input, shape index: {}]   ;;  %s626_s1 = inlined_call_operand.hbm [shape: f32[136,128], index: 1, kind: input, shape index: {}]   ;;  %s627_s2 = inlined_call_operand.vmem [shape: f32[8,128], index: 2, kind: output, shape index: {}]  }
   0x1   :  { %s15_s10 = sshll.u32 %s561_s9, 4  ;;  %s537_s13 = scalar_lea.hbm %s626_s1, 2176  ;;  %s16_s10 = int_to_ptr.vmem [resolvable:$true] %s15_s10 }
   0x2   :  { %p538_p0 = scmp.ne.s32.totalorder %s626_s1, %s537_s13  ;;  %p541_p1 = scmp.lt.u32.totalorder %s537_s13, %s626_s1 }
   0x4   :  { %p543_p2 = pnand %p541_p1, %p538_p0 }
   0x6   :  { %546 = shalt.err (!%p543_p2)
}
   0x7   :  { %s547_s18 = scalar_lea.vmem %s16_s10, 2176  ;;  %p552_p4 = scmp.lt.s32.totalorder %s16_s10, %s16_s10 }
   0x8   :  { %p548_p3 = scmp.ne.s32.totalorder %s16_s10, %s547_s18  ;;  %p553_p5 = scmp.lt.s32.totalorder %s547_s18, %s547_s18 }
   0xa   :  { %p554_p6 = por %p553_p5, %p552_p4 }
   0xc   :  { %p555_p7 = pnand %p554_p6, %p548_p3 }
   0xe   :  { %558 = shalt.err (!%p555_p7)
}
   0xf   :  { %s562_s19 = smov 128   ;;  %s563_s20 = smov 8  }
  0x10   :  { %21 = dma.hbm_to_vmem [thread:$0]  %s626_s1, 2176, %s16_s10, [#allocation3], %s562_s19, %s562_s19, %s563_s20  }
  0x11   :  { %559 = dma.done.wait [#allocation3], 2176  }
  0x12   :  { %560 = vsyncadd [#allocation3], 4294965120  ;;  %v564_v0 = vmov 8   ;;  %vm123_vm0 = vcmask 64512   ;;  %v25_v1 = vld [vmem:[%s625_s0] sm:$0xff]  ;;  %v27_v3 = vld [vmem:[#allocation2 + $0x8] sm:$0xff] }
  0x13   :  { %535 = vset.pattern.permute.xlu0 %v564_v0  ;;  %536 = vset.pattern.permute.xlu1 %v564_v0  ;;  %v26_v2 = vld [vmem:[#allocation2] sm:$0xff]  ;;  %v28_v4 = vld [vmem:[#allocation2 + $0x10] sm:$0xff]  ;;  %v29_v5 = vld [vmem:[#allocation2 + $0x18] sm:$0xff]  ;;  %v565_v18 = vmov 0.0|0.0   ;;  %vm566_vm1 = vmmov 0   ;;  %v567_v19 = vmov 0.0  }
  0x14   :  { %443 = vmatprep.subr.mxu0 %v25_v1  ;;  %445 = vmatprep.mubr.msk.f32.mxu0 %vm123_vm0, %v26_v2  ;;  %v30_v6 = vld [vmem:[#allocation2 + $0x20] sm:$0xff]  ;;  %v31_v7 = vld [vmem:[#allocation2 + $0x28] sm:$0xff]  ;;  %v32_v8 = vld [vmem:[#allocation2 + $0x30] sm:$0xff] }
  0x15   :  { %444 = vmatpush3.msra.mxu0 %v25_v1  ;;  %45 = vperm.xlu0 %535, %v26_v2   ;;  %v33_v9 = vld [vmem:[#allocation2 + $0x38] sm:$0xff]  ;;  %v34_v10 = vld [vmem:[#allocation2 + $0x40] sm:$0xff]  ;;  %v35_v11 = vld [vmem:[#allocation2 + $0x48] sm:$0xff] }
  0x16   :  { %446 = vmatmul.mubr.msk.f32.vlgmr.msra.gmra.mrb[0].mxu0 %vm123_vm0, %v27_v3  ;;  %55 = vperm.xlu1 %536, %v28_v4   ;;  %v36_v12 = vld [vmem:[#allocation2 + $0x50] sm:$0xff]  ;;  %v37_v13 = vld [vmem:[#allocation2 + $0x58] sm:$0xff]  ;;  %v38_v14 = vld [vmem:[#allocation2 + $0x60] sm:$0xff] }
  0x17   :  { %448 = vmatprep.mubr.msk.f32.mxu0 %vm123_vm0, %v28_v4  ;;  %v39_v15 = vld [vmem:[#allocation2 + $0x68] sm:$0xff]  ;;  %v40_v16 = vld [vmem:[#allocation2 + $0x70] sm:$0xff]  ;;  %v41_v17 = vld [vmem:[#allocation2 + $0x78] sm:$0xff]  ;;  %504 = vmatprep.subr.bf16.mxu1 %v565_v18 }
  0x18   :  { %501 = vmatprep.mubr.msk.f32.mxu1 %vm566_vm1, %v567_v19 }
  0x19   :  { %50 = vperm.xlu0 %535, %v27_v3  }
  0x1a   :  { %449 = vmatmul.mubr.msk.f32.gmra.mrb[2].mxu0 %vm123_vm0, %v29_v5  ;;  %60 = vperm.xlu1 %536, %v29_v5  }
  0x1b   :  { %451 = vmatprep.mubr.msk.f32.mxu0 %vm123_vm0, %v30_v6 }
  0x1d   :  { %65 = vperm.xlu0 %535, %v30_v6  }
  0x1e   :  { %452 = vmatmul.mubr.msk.f32.gmra.mrb[4].mxu0 %vm123_vm0, %v31_v7  ;;  %70 = vperm.xlu1 %536, %v31_v7  }
  0x1f   :  { %454 = vmatprep.mubr.msk.f32.mxu0 %vm123_vm0, %v32_v8 }
  0x21   :  { %75 = vperm.xlu0 %535, %v32_v8  }
  0x22   :  { %455 = vmatmul.mubr.msk.f32.gmra.mrb[6].mxu0 %vm123_vm0, %v33_v9  ;;  %80 = vperm.xlu1 %536, %v33_v9  }
  0x23   :  { %457 = vmatprep.mubr.msk.f32.mxu0 %vm123_vm0, %v34_v10 }
  0x25   :  { %85 = vperm.xlu0 %535, %v34_v10  }
  0x26   :  { %458 = vmatmul.mubr.msk.f32.gmra.mrb[8].mxu0 %vm123_vm0, %v35_v11  ;;  %90 = vperm.xlu1 %536, %v35_v11  }
  0x27   :  { %460 = vmatprep.mubr.msk.f32.mxu0 %vm123_vm0, %v36_v12 }
  0x29   :  { %95 = vperm.xlu0 %535, %v36_v12  }
  0x2a   :  { %461 = vmatmul.mubr.msk.f32.gmra.mrb[10].mxu0 %vm123_vm0, %v37_v13  ;;  %100 = vperm.xlu1 %536, %v37_v13  }
  0x2b   :  { %463 = vmatprep.mubr.msk.f32.mxu0 %vm123_vm0, %v38_v14 }
  0x2d   :  { %105 = vperm.xlu0 %535, %v38_v14  }
  0x2e   :  { %464 = vmatmul.mubr.msk.f32.gmra.mrb[12].mxu0 %vm123_vm0, %v39_v15  ;;  %110 = vperm.xlu1 %536, %v39_v15  }
  0x2f   :  { %466 = vmatprep.mubr.msk.f32.mxu0 %vm123_vm0, %v40_v16 }
  0x31   :  { %115 = vperm.xlu0 %535, %v40_v16  }
  0x32   :  { %467 = vmatmul.mubr.msk.f32.gmra.mrb[14].mxu0 %vm123_vm0, %v41_v17  ;;  %120 = vperm.xlu1 %536, %v41_v17  }
  0x94   :  { %v46_v21 = vpop.permute.xlu0 %45 }
  0x95   :  { %v56_v20 = vpop.permute.xlu1 %55 }
  0x98   :  { %v51_v23 = vpop.permute.xlu0 %50 }
  0x99   :  { %v61_v22 = vpop.permute.xlu1 %60 }
  0x9c   :  { %v66_v25 = vpop.permute.xlu0 %65 }
  0x9d   :  { %v71_v24 = vpop.permute.xlu1 %70 }
  0xa0   :  { %v76_v34 = vpop.permute.xlu0 %75 }
  0xa1   :  { %v81_v31 = vpop.permute.xlu1 %80 }
  0xa4   :  { %v86_v47 = vpop.permute.xlu0 %85 }
  0xa5   :  { %v91_v44 = vpop.permute.xlu1 %90 }
  0xa8   :  { %v96_v59 = vpop.permute.xlu0 %95 }
  0xa9   :  { %v101_v56 = vpop.permute.xlu1 %100 }
  0xac   :  { %v106_v8 = vpop.permute.xlu0 %105 }
  0xad   :  { %v111_v5 = vpop.permute.xlu1 %110 }
  0xb1   :  { %v121_v17 = vpop.permute.xlu1 %120 }
  0xe9   :  { %v447_v26 = vpop.f32.mrb[0].mxu0 }
  0xea   :  { %v228_v27 = vadd.f32 %v447_v26, %v51_v23  ;;  %v222_v28 = vpop.f32.mrb[1].mxu0 }
  0xeb   :  { %v223_v29 = vadd.f32 %v222_v28, %v46_v21  ;;  %v116_v21 = vpop.permute.xlu0 %115 }
  0xec   :  { %v302_v30 = vmax.f32 %v228_v27, 0.0 }
  0xed   :  { %v301_v32 = vmax.f32 %v223_v29, 0.0  ;;  %v450_v33 = vpop.f32.mrb[2].mxu0  ;;  %v42_v29 = vld [vmem:[#allocation2 + $0x80] sm:$0xff] }
  0xee   :  { %v238_v35 = vadd.f32 %v450_v33, %v61_v22  ;;  %v232_v36 = vpop.f32.mrb[3].mxu0 }
  0xef   :  { %v233_v37 = vadd.f32 %v232_v36, %v56_v20  ;;  %v505_v38 = vpack.c.bf16 %v302_v30, %v301_v32 }
  0xf0   :  { %v304_v39 = vmax.f32 %v238_v35, 0.0 }
  0xf1   :  { %v303_v40 = vmax.f32 %v233_v37, 0.0  ;;  %v453_v41 = vpop.f32.mrb[4].mxu0  ;;  %506 = vmatpush3.bf16.msra.mxu1 %v505_v38 }
  0xf2   :  { %v248_v42 = vadd.f32 %v453_v41, %v71_v24  ;;  %v242_v43 = vpop.f32.mrb[5].mxu0  ;;  %507 = vmatprep.subr.bf16.mxu1 %v565_v18 }
  0xf3   :  { %v508_v45 = vpack.c.bf16 %v304_v39, %v303_v40  ;;  %v243_v46 = vadd.f32 %v242_v43, %v66_v25 }
  0xf4   :  { %v306_v48 = vmax.f32 %v248_v42, 0.0 }
  0xf5   :  { %v305_v49 = vmax.f32 %v243_v46, 0.0  ;;  %v456_v50 = vpop.f32.mrb[6].mxu0  ;;  %509 = vmatpush3.bf16.msra.mxu1 %v508_v45 }
  0xf6   :  { %v258_v51 = vadd.f32 %v456_v50, %v81_v31  ;;  %v252_v52 = vpop.f32.mrb[7].mxu0  ;;  %510 = vmatprep.subr.bf16.mxu1 %v565_v18 }
  0xf7   :  { %v511_v53 = vpack.c.bf16 %v306_v48, %v305_v49  ;;  %v253_v54 = vadd.f32 %v252_v52, %v76_v34 }
  0xf8   :  { %v308_v55 = vmax.f32 %v258_v51, 0.0 }
  0xf9   :  { %v307_v57 = vmax.f32 %v253_v54, 0.0  ;;  %v459_v58 = vpop.f32.mrb[8].mxu0  ;;  %512 = vmatpush3.bf16.msra.mxu1 %v511_v53 }
  0xfa   :  { %v268_v60 = vadd.f32 %v459_v58, %v91_v44  ;;  %v262_v61 = vpop.f32.mrb[9].mxu0  ;;  %513 = vmatprep.subr.bf16.mxu1 %v565_v18 }
  0xfb   :  { %v514_v62 = vpack.c.bf16 %v308_v55, %v307_v57  ;;  %v263_v63 = vadd.f32 %v262_v61, %v86_v47 }
  0xfc   :  { %v310_v0 = vmax.f32 %v268_v60, 0.0 }
  0xfd   :  { %v309_v1 = vmax.f32 %v263_v63, 0.0  ;;  %v462_v2 = vpop.f32.mrb[10].mxu0  ;;  %515 = vmatpush3.bf16.msra.mxu1 %v514_v62 }
  0xfe   :  { %v278_v3 = vadd.f32 %v462_v2, %v101_v56  ;;  %v272_v4 = vpop.f32.mrb[11].mxu0  ;;  %516 = vmatprep.subr.bf16.mxu1 %v565_v18 }
  0xff   :  { %v517_v6 = vpack.c.bf16 %v310_v0, %v309_v1  ;;  %v273_v7 = vadd.f32 %v272_v4, %v96_v59 }
 0x100   :  { %v312_v9 = vmax.f32 %v278_v3, 0.0 }
 0x101   :  { %v311_v10 = vmax.f32 %v273_v7, 0.0  ;;  %v465_v11 = vpop.f32.mrb[12].mxu0  ;;  %518 = vmatpush3.bf16.msra.mxu1 %v517_v6 }
 0x102   :  { %v288_v12 = vadd.f32 %v465_v11, %v111_v5  ;;  %v282_v13 = vpop.f32.mrb[13].mxu0  ;;  %519 = vmatprep.subr.bf16.mxu1 %v565_v18 }
 0x103   :  { %v520_v14 = vpack.c.bf16 %v312_v9, %v311_v10  ;;  %v283_v15 = vadd.f32 %v282_v13, %v106_v8 }
 0x104   :  { %v314_v16 = vmax.f32 %v288_v12, 0.0 }
 0x105   :  { %v313_v19 = vmax.f32 %v283_v15, 0.0  ;;  %v468_v20 = vpop.f32.mrb[14].mxu0  ;;  %521 = vmatpush3.bf16.msra.mxu1 %v520_v14 }
 0x106   :  { %v298_v22 = vadd.f32 %v468_v20, %v121_v17  ;;  %v292_v23 = vpop.f32.mrb[15].mxu0  ;;  %522 = vmatprep.subr.bf16.mxu1 %v565_v18 }
 0x107   :  { %v523_v24 = vpack.c.bf16 %v314_v16, %v313_v19  ;;  %v293_v25 = vadd.f32 %v292_v23, %v116_v21 }
 0x108   :  { %v316_v26 = vmax.f32 %v298_v22, 0.0 }
 0x109   :  { %v315_v27 = vmax.f32 %v293_v25, 0.0  ;;  %524 = vmatpush3.bf16.msra.mxu1 %v523_v24 }
 0x10a   :  { %525 = vmatprep.subr.bf16.mxu1 %v565_v18 }
 0x10b   :  { %v526_v28 = vpack.c.bf16 %v316_v26, %v315_v27 }
 0x10d   :  { %527 = vmatpush3.bf16.msra.mxu1 %v526_v28 }
 0x110   :  { %502 = vmatmul.mubr.f32.vlgmr.msra.gmra.mrb[0].mxu1 %v42_v29 }
 0x1e3   :  { %v383_v30 = vpop.f32.mrb[0].mxu1 }
 0x1e4   :  { %387 = vst [vmem:[%s627_s2] sm:$0xff] %v383_v30  ;;  %v503_v31 = vpop.f32.mrb[1].mxu1 }
 0x1e5   :  { %392 = vsyncpa [#allocation3], 1 }

</bundles_post_ra>
